<compile_context>
chip_gen: v7x
topology: tpu7x:2x2x1
jax: 0.10.0
libtpu: 0.0.40
codegen_flags: <defaults>
</compile_context>

<pallas_src>
import functools

import jax
import jax.numpy as jnp
import numpy as np
from jax.experimental import pallas as pl
from jax.experimental.pallas import tpu as pltpu


def _round_up(v, m):
    return ((v + m - 1) // m) * m


def _round_down_mult(v, m):
    return (v // m) * m


def _vmem_budgets():
    """(per-step working-set budget bytes, vmem_limit_bytes), generation aware."""
    phys = None
    try:
        info = pltpu.get_tpu_info()
        for attr in ("vmem_capacity_bytes", "vmem_bytes", "vmem_size_bytes"):
            v = getattr(info, attr, None)
            if isinstance(v, (int, np.integer)) and v > 0:
                phys = int(v)
                break
    except Exception:
        phys = None
    if phys is not None and phys >= 100 * 1024 * 1024:
        # v5e / v6e: 128 MiB physical VMEM -> ~8 MiB input blocks.
        return 48 * 1024 * 1024, 64 * 1024 * 1024
    # v7x (64 MiB physical VMEM) or unknown: stay conservative (~4 MiB blocks).
    return 24 * 1024 * 1024, 48 * 1024 * 1024


def _pick_channel_tile(N, C, HW_pad, per_elem_bytes, budget_bytes, min_steps=8):
    """Largest channel tile TC (multiple of 8 dividing C, or C itself) whose
    per-step working set fits the budget; prefers tiles that leave >= min_steps
    grid steps for pipelining / megacore sharding. Returns None if even the
    smallest legal tile is over budget (caller falls back to the HW-tiled path)."""
    cands = {C}
    if C % 8 == 0:
        cands |= {t for t in range(8, C, 8) if C % t == 0}
    fitting = [t for t in cands if t * HW_pad * per_elem_bytes <= budget_bytes]
    if not fitting:
        return None
    stepped = [t for t in fitting if N * (C // t) >= min_steps]
    return max(stepped) if stepped else max(fitting)


# ----------------------------- single-pass path ------------------------------


def _adain_onepass_kernel(x_ref, style_ref, o_ref, *, hw, tc, padded):
    # x_ref:     (1, TC, HW_pad) one channel tile, spatial flattened on lanes.
    # style_ref: (1, C, 2) whole per-image style row (resident across the c axis);
    #            [..., 0] = shift (style[0]), [..., 1] = scale (style[1]).
    x = x_ref[...].astype(jnp.float32)
    inv_hw = jnp.float32(1.0 / hw)

    # Zero padding does not perturb the sum -> mean is exact.
    mu = jnp.sum(x, axis=-1, keepdims=True) * inv_hw                 # (1, TC, 1)

    # `diff` is only used inside the variance reduction (the epilogue re-uses x),
    # so nothing block-sized has to survive the reduction -> scale dependency.
    diff = x - mu
    if padded:
        lane = jax.lax.broadcasted_iota(jnp.int32, x.shape, 2)
        diff = jnp.where(lane < hw, diff, 0.0)
    var = jnp.sum(diff * diff, axis=-1, keepdims=True) * inv_hw      # (1, TC, 1)

    if tc == style_ref.shape[1]:
        s = style_ref[...].astype(jnp.float32)                       # (1, TC, 2)
    else:
        c = pl.program_id(1)
        off = pl.multiple_of(c * tc, 8)     # tc is a multiple of 8 when tc < C
        s = style_ref[:, pl.ds(off, tc), :].astype(jnp.float32)      # (1, TC, 2)
    smu, ssig = s[..., 0:1], s[..., 1:2]

    scale = ssig * jax.lax.rsqrt(var)       # rsqrt -> EUP slot
    shift = smu - mu * scale
    o_ref[...] = (x * scale + shift).astype(o_ref.dtype)


def _onepass_call(x2, s2, N, C, HW, HW_pad, TC, padded, vmem_limit):
    kernel = functools.partial(_adain_onepass_kernel, hw=HW, tc=TC, padded=padded)
    return pl.pallas_call(
        kernel,
        out_shape=jax.ShapeDtypeStruct((N, C, HW_pad), x2.dtype),
        grid_spec=pltpu.PrefetchScalarGridSpec(
            num_scalar_prefetch=0,
            grid=(N, C // TC),
            in_specs=[
                pl.BlockSpec((1, TC, HW_pad), lambda n, c: (n, c, 0)),
                # Whole per-image style row; block index constant in c -> stays
                # resident in VMEM, no tiny per-step DMA.
                pl.BlockSpec((1, C, 2), lambda n, c: (n, 0, 0)),
            ],
            out_specs=pl.BlockSpec((1, TC, HW_pad), lambda n, c: (n, c, 0)),
        ),
        compiler_params=pltpu.CompilerParams(
            dimension_semantics=("parallel", "parallel"),
            vmem_limit_bytes=vmem_limit,
        ),
    )(x2, s2)


# --------------------- large-H*W fallback (two kernels) ----------------------


def _adain_stats_kernel(x_ref, style_ref, scale_ref, shift_ref, sum_ref, sq_ref,
                        *, hw, thw, padded):
    # Accumulate per-channel sum / sum-of-squares over HW tiles ("arbitrary" axis);
    # finalize into per-channel (scale, shift) on the last tile.
    h = pl.program_id(2)

    @pl.when(h == 0)
    def _():
        sum_ref[...] = jnp.zeros_like(sum_ref)
        sq_ref[...] = jnp.zeros_like(sq_ref)

    x = x_ref[...].astype(jnp.float32)                 # (1, TC, THW)
    if padded:
        lane = jax.lax.broadcasted_iota(jnp.int32, x.shape, 2) + h * thw
        x = jnp.where(lane < hw, x, 0.0)
    sum_ref[...] += jnp.sum(x, axis=-1, keepdims=True)
    sq_ref[...] += jnp.sum(x * x, axis=-1, keepdims=True)

    @pl.when(h == pl.num_programs(2) - 1)
    def _():
        inv_hw = jnp.float32(1.0 / hw)
        mu = sum_ref[...] * inv_hw
        var = jnp.maximum(sq_ref[...] * inv_hw - mu * mu, 0.0)
        s = style_ref[...].astype(jnp.float32)         # (1, TC, 2)
        smu, ssig = s[..., 0:1], s[..., 1:2]
        sc = ssig * jax.lax.rsqrt(var)
        scale_ref[...] = sc
        shift_ref[...] = smu - mu * sc


def _adain_apply_kernel(x_ref, scale_ref, shift_ref, o_ref):
    o_ref[...] = (x_ref[...].astype(jnp.float32) * scale_ref[...]
                  + shift_ref[...]).astype(o_ref.dtype)


def _twopass_call(x2, s2, N, C, HW, HW_pad, TC, THW, padded, vmem_limit):
    nh = HW_pad // THW

    scale, shift = pl.pallas_call(
        functools.partial(_adain_stats_kernel, hw=HW, thw=THW, padded=padded),
        out_shape=(jax.ShapeDtypeStruct((N, C, 1), jnp.float32),
                   jax.ShapeDtypeStruct((N, C, 1), jnp.float32)),
        grid_spec=pltpu.PrefetchScalarGridSpec(
            num_scalar_prefetch=0,
            grid=(N, C // TC, nh),
            in_specs=[
                pl.BlockSpec((1, TC, THW), lambda n, c, h: (n, c, h)),
                pl.BlockSpec((1, TC, 2), lambda n, c, h: (n, c, 0)),
            ],
            out_specs=[pl.BlockSpec((1, TC, 1), lambda n, c, h: (n, c, 0)),
                       pl.BlockSpec((1, TC, 1), lambda n, c, h: (n, c, 0))],
            scratch_shapes=[pltpu.VMEM((1, TC, 1), jnp.float32),
                            pltpu.VMEM((1, TC, 1), jnp.float32)],
        ),
        compiler_params=pltpu.CompilerParams(
            dimension_semantics=("parallel", "parallel", "arbitrary"),
            vmem_limit_bytes=vmem_limit,
        ),
    )(x2, s2)

    return pl.pallas_call(
        _adain_apply_kernel,
        out_shape=jax.ShapeDtypeStruct((N, C, HW_pad), x2.dtype),
        grid_spec=pltpu.PrefetchScalarGridSpec(
            num_scalar_prefetch=0,
            grid=(N, C // TC, nh),
            in_specs=[
                pl.BlockSpec((1, TC, THW), lambda n, c, h: (n, c, h)),
                pl.BlockSpec((1, TC, 1), lambda n, c, h: (n, c, 0)),
                pl.BlockSpec((1, TC, 1), lambda n, c, h: (n, c, 0)),
            ],
            out_specs=pl.BlockSpec((1, TC, THW), lambda n, c, h: (n, c, h)),
        ),
        compiler_params=pltpu.CompilerParams(
            dimension_semantics=("parallel", "parallel", "parallel"),
            vmem_limit_bytes=vmem_limit,
        ),
    )(x2, scale, shift)


# --------------------------------- wrapper -----------------------------------


def adain_val(x, style, *, working_budget_bytes=None, vmem_limit_bytes=None):
    """x: (N, C, H, W); style: (2, N, C) with style[0]=shift, style[1]=scale."""
    N, C, H, W = x.shape
    HW = H * W
    x2 = x.reshape(N, C, HW)
    # Fuse the two style planes into one input: (2, N, C) -> (N, C, 2).
    s2 = jnp.transpose(style, (1, 2, 0))

    default_ws, default_limit = _vmem_budgets()
    ws = default_ws if working_budget_bytes is None else working_budget_bytes
    limit = default_limit if vmem_limit_bytes is None else vmem_limit_bytes

    itemsize = jnp.dtype(x.dtype).itemsize
    # Per-element working set: double-buffered input + output blocks plus ~2
    # block-sized f32 temporaries inside the kernel.
    per_elem = 4 * itemsize + 8

    # Lane-dense spatial axis (multiple of 128) so stores are full vst.
    HW_pad = _round_up(HW, 128)
    TC = _pick_channel_tile(N, C, HW_pad, per_elem, ws)

    if TC is not None:
        padded = HW_pad != HW
        xp = jnp.pad(x2, ((0, 0), (0, 0), (0, HW_pad - HW))) if padded else x2
        out = _onepass_call(xp, s2, N, C, HW, HW_pad, TC, padded, limit)
    else:
        # Large H*W: even the smallest channel tile blows the budget. Tile HW on
        # an 'arbitrary' reduction axis, then apply scale/shift in a second pass.
        TC = 8 if C % 8 == 0 else C
        # TODO(synk): if C is huge and not a multiple of 8, TC=C with THW=128 can
        # still exceed the budget; would need a masked partial channel tile.
        THW = max(_round_down_mult(ws // (TC * per_elem), 128), 128)
        THW = min(THW, _round_up(HW, 128))
        HW_pad = _round_up(HW, THW)
        padded = HW_pad != HW
        xp = jnp.pad(x2, ((0, 0), (0, 0), (0, HW_pad - HW))) if padded else x2
        out = _twopass_call(xp, s2, N, C, HW, HW_pad, TC, THW, padded, limit)

    if out.shape[-1] != HW:
        out = out[:, :, :HW]
    return out.reshape(N, C, H, W)


def adain_ref(x, style):
    """Pure-JAX reference mirroring the PyTorch forward exactly (in f32)."""
    x = x.astype(jnp.float32)
    style = style.astype(jnp.float32)
    N, C, H, W = x.shape
    mu = jnp.sum(x, axis=(2, 3)) / (H * W)                           # (N, C)
    xp = jnp.transpose(x, (2, 3, 0, 1))                              # (H, W, N, C)
    centered = jnp.transpose(xp - mu, (2, 3, 0, 1))                  # (N, C, H, W)
    sigma = jnp.sqrt(jnp.sum(centered ** 2, axis=(2, 3)) / (H * W))  # (N, C)
    y = style[1] * ((xp - mu) / sigma) + style[0]                    # (H, W, N, C)
    return jnp.transpose(y, (2, 3, 0, 1))                            # (N, C, H, W)


if __name__ == "__main__":
    key = jax.random.PRNGKey(0)
    kx, ks0, ks1 = jax.random.split(key, 3)

    def make_inputs(N, C, H, W, dtype=jnp.float32):
        x = jax.random.normal(kx, (N, C, H, W), dtype=jnp.float32)
        smu = jax.random.normal(ks0, (N, C), dtype=jnp.float32)
        ssig = jnp.abs(jax.random.normal(ks1, (N, C), dtype=jnp.float32)) + 0.5
        style = jnp.stack([smu, ssig], axis=0)                       # (2, N, C)
        return x.astype(dtype), style.astype(dtype)

    # 1) Main path: single-pass, lane-dense H*W, f32.
    x, style = make_inputs(2, 4, 16, 16)
    out = jax.block_until_ready(adain_val(x, style))
    np.testing.assert_allclose(np.asarray(out), np.asarray(adain_ref(x, style)),
                               rtol=1e-5, atol=1e-5)

    # 2) Ragged spatial size (H*W % 128 != 0): padded + masked variance path.
    x, style = make_inputs(2, 4, 15, 15)
    out = jax.block_until_ready(adain_val(x, style))
    np.testing.assert_allclose(np.asarray(out), np.asarray(adain_ref(x, style)),
                               rtol=1e-5, atol=1e-5)

    # 3) Large-H*W fallback (HW tiled on an 'arbitrary' reduction axis), forced by
    #    a tiny working-set budget so it runs at small test shapes.
    x, style = make_inputs(2, 8, 30, 30)
    out = jax.block_until_ready(adain_val(x, style, working_budget_bytes=100_000))
    np.testing.assert_allclose(np.asarray(out), np.asarray(adain_ref(x, style)),
                               rtol=1e-3, atol=1e-3)

    # 4) bfloat16 inputs (one-pass path, output quantized to bf16).
    x, style = make_inputs(2, 8, 16, 16, dtype=jnp.bfloat16)
    out = jax.block_until_ready(adain_val(x, style))
    np.testing.assert_allclose(np.asarray(out.astype(jnp.float32)),
                               np.asarray(adain_ref(x, style)),
                               rtol=2e-2, atol=2e-2)

    # 5) Multiple channel tiles per image (TC < C): exercises the resident-style
    #    in-kernel slice and the (2, 2) grid.
    x, style = make_inputs(2, 16, 16, 16)
    out = jax.block_until_ready(adain_val(x, style, working_budget_bytes=60_000))
    np.testing.assert_allclose(np.asarray(out), np.asarray(adain_ref(x, style)),
                               rtol=1e-5, atol=1e-5)

    print("KERNEL_OK")
</pallas_src>

<mosaic_0001>
module attributes {stable_mosaic.version = 11 : i64} {
  func.func @_adain_onepass_kernel(%arg0: i32, %arg1: i32, %arg2: memref<1x4x256xf32, #tpu.memory_space<vmem>>, %arg3: memref<1x4x2xf32, #tpu.memory_space<vmem>>, %arg4: memref<1x4x256xf32, #tpu.memory_space<vmem>>) attributes {dimension_semantics = [#tpu.dimension_semantics<parallel>, #tpu.dimension_semantics<parallel>], iteration_bounds = array<i64: 2, 1>, scalar_prefetch = 0 : i64, scratch_operands = 0 : i64, tpu.core_type = #tpu.core_type<tc>, window_params = [{transform_indices = @transform_0, window_bounds = array<i64: 1, 4, 256>}, {transform_indices = @transform_1, window_bounds = array<i64: 1, 4, 2>}, {transform_indices = @transform_2, window_bounds = array<i64: 1, 4, 256>}]} {
    %c0 = arith.constant 0 : index
    %c0_0 = arith.constant 0 : index
    %c0_1 = arith.constant 0 : index
    %0 = vector.load %arg2[%c0, %c0_0, %c0_1] : memref<1x4x256xf32, #tpu.memory_space<vmem>>, vector<1x4x256xf32>
    %cst = arith.constant dense<0.000000e+00> : vector<1x4xf32>
    %1 = vector.multi_reduction <add>, %0, %cst [2] : vector<1x4x256xf32> to vector<1x4xf32>
    %2 = vector.shape_cast %1 : vector<1x4xf32> to vector<1x4x1xf32>
    %cst_2 = arith.constant 3.906250e-03 : f32
    %3 = vector.broadcast %cst_2 : f32 to vector<1x4x1xf32>
    %4 = arith.mulf %2, %3 : vector<1x4x1xf32>
    %5 = vector.broadcast %4 : vector<1x4x1xf32> to vector<1x4x256xf32>
    %6 = arith.subf %0, %5 : vector<1x4x256xf32>
    %7 = arith.mulf %6, %6 : vector<1x4x256xf32>
    %cst_3 = arith.constant dense<0.000000e+00> : vector<1x4xf32>
    %8 = vector.multi_reduction <add>, %7, %cst_3 [2] : vector<1x4x256xf32> to vector<1x4xf32>
    %9 = vector.shape_cast %8 : vector<1x4xf32> to vector<1x4x1xf32>
    %cst_4 = arith.constant 3.906250e-03 : f32
    %10 = vector.broadcast %cst_4 : f32 to vector<1x4x1xf32>
    %11 = arith.mulf %9, %10 : vector<1x4x1xf32>
    %c0_5 = arith.constant 0 : index
    %c0_6 = arith.constant 0 : index
    %c0_7 = arith.constant 0 : index
    %12 = vector.load %arg3[%c0_5, %c0_6, %c0_7] : memref<1x4x2xf32, #tpu.memory_space<vmem>>, vector<1x4x2xf32>
    %13 = vector.extract_strided_slice %12 {offsets = [0, 0, 0], sizes = [1, 4, 1], strides = [1, 1, 1]} : vector<1x4x2xf32> to vector<1x4x1xf32>
    %14 = vector.extract_strided_slice %12 {offsets = [0, 0, 1], sizes = [1, 4, 1], strides = [1, 1, 1]} : vector<1x4x2xf32> to vector<1x4x1xf32>
    %15 = math.rsqrt %11 : vector<1x4x1xf32>
    %16 = arith.mulf %14, %15 : vector<1x4x1xf32>
    %17 = arith.mulf %4, %16 : vector<1x4x1xf32>
    %18 = arith.subf %13, %17 : vector<1x4x1xf32>
    %19 = vector.broadcast %16 : vector<1x4x1xf32> to vector<1x4x256xf32>
    %20 = arith.mulf %0, %19 : vector<1x4x256xf32>
    %21 = vector.broadcast %18 : vector<1x4x1xf32> to vector<1x4x256xf32>
    %22 = arith.addf %20, %21 : vector<1x4x256xf32>
    %c0_8 = arith.constant 0 : index
    %c0_9 = arith.constant 0 : index
    %c0_10 = arith.constant 0 : index
    %23 = vector.load %arg4[%c0_8, %c0_9, %c0_10] : memref<1x4x256xf32, #tpu.memory_space<vmem>>, vector<1x4x256xf32>
    tpu.vector_store %arg4[%c0_8, %c0_9, %c0_10], %22 {strides = array<i32>} : memref<1x4x256xf32, #tpu.memory_space<vmem>>, vector<1x4x256xf32>,
    return
  }
  func.func @transform_0(%arg0: i32, %arg1: i32) -> (i32, i32, i32) {
    %c0_i32 = arith.constant 0 : i32
    %c0_i32_0 = arith.constant 0 : i32
    return %arg0, %arg1, %c0_i32 : i32, i32, i32
  }
  func.func @transform_1(%arg0: i32, %arg1: i32) -> (i32, i32, i32) {
    %c0_i32 = arith.constant 0 : i32
    %c0_i32_0 = arith.constant 0 : i32
    %c0_i32_1 = arith.constant 0 : i32
    return %arg0, %c0_i32, %c0_i32_0 : i32, i32, i32
  }
  func.func @transform_2(%arg0: i32, %arg1: i32) -> (i32, i32, i32) {
    %c0_i32 = arith.constant 0 : i32
    %c0_i32_0 = arith.constant 0 : i32
    return %arg0, %arg1, %c0_i32 : i32, i32, i32
  }
}

</mosaic_0001>

<bundles_post_ra>
// kernel: tpu_custom_call.1
= control target key start
LH: loop header
LB: loop body
LE: loop exit
PB: predicated region body
PF: predicated region fallthrough
CT: control target
= control target key end

     0   :  { %7 = vsyncpa [#allocation3], 0  ;;  %s784_s0 = inlined_call_operand.hbm [shape: f32[2,4,256], index: 0, kind: input, shape index: {}]   ;;  %s785_s1 = inlined_call_operand.vmem [shape: f32[2,4,2], index: 1, kind: input, shape index: {}]   ;;  %s786_s2 = inlined_call_operand.hbm [shape: f32[2,4,256], index: 2, kind: output, shape index: {}]  }
   0x1   :  { %9 = vsyncpa [#allocation3 + $0x1], 0 }
   0x2   :  { %10 = vsyncpa [#allocation4], 0 }
   0x3   :  { %12 = vsyncpa [#allocation4 + $0x1], 0  ;;  %s599_s9 = smov 0   ;;  %s601_s10 = smov 0  }
   0x4   :  { %s603_s11 = smov 0   ;;  %s605_s12 = smov 0  }
   0x5   :  { %s607_s13 = smov 0   ;;  %s609_s14 = smov 0  }
   0x6 LB: > { %s375_s15 = sadd.s32 4294967295, %s576_s14   ;;  %s376_s16 = sadd.s32 4294967294, %s576_s14   ;;  %s576_s14 = sphi %s609_s14, %s18_s14   ;;  %s572_s13 = sphi %s607_s13, %s802_s13   ;;  %s568_s12 = sphi %s605_s12, %s801_s12   ;;  %s564_s11 = sphi %s603_s11, %s800_s11   ;;  %s560_s10 = sphi %s601_s10, %s799_s10   ;;  %s556_s9 = sphi %s599_s9, %s798_s9  }
   0x7   : > { %s30_s17 = sadd.s32 1, %s572_s13  ;;  %s39_s18 = sadd.s32 1, %s564_s11 }
   0x8   : > { %p32_p0 = scmp.ge.s32.totalorder %s30_s17, 2  ;;  %p46_p1 = scmp.ne.s32.totalorder %s564_s11, %s560_s10 }
   0x9   : > { %p47_p2 = scmp.eq.s32.totalorder %s576_s14, 0  ;;  %p52_p3 = scmp.ne.s32.totalorder %s560_s10, %s556_s9 }
   0xa   : > { %s804_s17 = smov (%p32_p0, %s30_s17), 0  ;;  %p53_p5 = scmp.eq.s32.totalorder %s375_s15, 0 }
   0xb   : > { %p640_p4 = por %p47_p2, %p46_p1  ;;  %s34_s20 = ssub.s32 %s572_s13, %s804_s17 }
   0xc   : > { %p104_p6 = scmp.eq.s32.totalorder %s375_s15, 1  ;;  %p37_p7 = scmp.eq.s32.totalorder %s34_s20, 0 }
   0xd   : > { %p646_p8 = por %p53_p5, %p52_p3  ;;  %p110_p10 = scmp.eq.s32.totalorder %s376_s16, 1 }
   0xe   : > { %p650_p9 = por %p104_p6, %p46_p1  ;;  %p405_p13 = scmp.lt.s32.totalorder %s576_s14, 2 }
   0xf   : > { %s655_s23 = scalar_select %p37_p7, %s564_s11, %s39_s18  }
  0x10   : > { %s790_s22 = scalar_select %p650_p9, 1, 0 }
  0x11   : > { %p657_p11 = por %p110_p10, %p52_p3  ;;  %s130_s25 = sand.u32 1, %s564_s11  }
  0x12   : > { %s379_s26 = sshll.u32 %s130_s25, 3  ;;  %s391_s27 = sshll.u32 %s572_s13, 7 }
  0x13   : > { %s791_s24 = scalar_select %p657_p11, 1, 0 }
  0x14   : > { %s668_s30 = scalar_lea.hbm %s784_s0, %s391_s27  ;;  %s134_s3 = scalar_lea.vmem [#allocation2], %s379_s26 }
  0x15   : > { %s144_s4 = sshll.u32 %s134_s3, 4  ;;  %p674_p0 = pnand %p405_p13, %p640_p4  ;;  %s670_s4 = int_to_ptr.vmem [resolvable:$true] %s144_s4 }
  0x16   : > { %s131_s6 = scalar_lea.sflag [#allocation3], %s130_s25  ;;  %s464_s7 = scalar_lea.hbm %s668_s30, 128 }
  0x17   : > { %p465_p3 = scmp.ne.s32.totalorder %s668_s30, %s464_s7  ;;  %p466_p5 = pneg %p674_p0 }
  0x18   : > { %s469_s16 = scalar_lea.hbm %s784_s0, 256  ;;  %p470_p4 = scmp.lt.u32.totalorder %s668_s30, %s784_s0 }
  0x19   : > { %p467_p6 = pnand %p466_p5, %p465_p3  ;;  %p471_p10 = scmp.lt.u32.totalorder %s469_s16, %s464_s7 }
  0x1a   : > { %p473_p12 = scmp.lt.u32.totalorder %s464_s7, %s668_s30 }
  0x1b   : > { %p468_p7 = pneg %p467_p6  ;;  %p472_p13 = por %p471_p10, %p470_p4 }
  0x1d   : > { %p474_p1 = por %p473_p12, %p472_p13 }
  0x1f   : > { %p475_p2 = pnand %p474_p1, %p468_p7 }
  0x21   : > { %478 = shalt.err (!%p475_p2)
}
  0x22   : > { %s479_s20 = scalar_lea.vmem %s670_s4, 128  ;;  %s578_s25 = smov [#allocation2]  }
  0x23   : > { %p480_p3 = scmp.ne.s32.totalorder %s670_s4, %s479_s20  ;;  %s484_s26 = sshll.u32 %s578_s25, 4  ;;  %s485_s26 = int_to_ptr.vmem [resolvable:$false] %s484_s26 }
  0x24   : > { %s486_s27 = scalar_lea.vmem %s485_s26, 256  ;;  %p487_p9 = scmp.lt.s32.totalorder %s670_s4, %s485_s26 }
  0x25   : > { %p482_p6 = pnand %p480_p3, %p466_p5  ;;  %p488_p4 = scmp.lt.s32.totalorder %s486_s27, %s479_s20 }
  0x27   : > { %p483_p11 = pneg %p482_p6  ;;  %p489_p10 = por %p488_p4, %p487_p9 }
  0x29   : > { %p490_p12 = pnand %p489_p10, %p483_p11 }
  0x2b   : > { %493 = shalt.err (!%p490_p12)
}
  0x2c   : > { %400 = dma.hbm_to_vmem [thread:$0]  (!%p674_p0), %s668_s30, 128, %s670_s4, %s131_s6  }
  0x2d   : > { %p793_p1 = scmp.lt.s32.totalorder %s576_s14, 3  ;;  %p794_p2 = scmp.ge.s32.totalorder %s576_s14, 1 }
  0x2f   : > { %p157_p5 = pnand %p794_p2, %p793_p1 }
  0x30   : > { %s710_s28 = sand.u32 (!%p157_p5), 1, %s560_s10  }
  0x31   : > { %160 = sbr.rel (%p157_p5) target bundleno = 640 (0x280), region = 28  ;;  %s383_s29 = sshll.u32 (!%p157_p5), %s710_s28, 3 }
  0x32   : > { %s163_s3 = scalar_lea.sflag (!%p157_p5), [#allocation3], %s710_s28  ;;  %s166_s5 = scalar_lea.vmem (!%p157_p5), [#allocation2], %s383_s29 }
  0x38   : > { %547 = dma.done.wait (%p646_p8), %s163_s3, 128  }
  0x39   : > { %549 = vsyncadd (%p646_p8), %s163_s3, 4294967168  ;;  %vm199_vm0 = vcmask 1043456   ;;  %v195_v0 = vld [vmem:[%s166_s5] sm:$0xff]  ;;  %v579_v5 = vmov 839922192   ;;  %v210_v7 = vlaneseq  ;;  %v580_v20 = vmov 1  }
  0x3a   : > { %v197_v1 = vcombine.high %v195_v0, %v195_v0  ;;  %v200_v2 = vsel %vm199_vm0, %v195_v0, 0.0  ;;  %v208_v6 = vunpack.c.l.s4 %v579_v5  ;;  %459 = vset.pattern.permute.xlu1 %v580_v20  ;;  %p191_p8 = scmp.lt.s32.totalorder %s568_s12, 1  ;;  %v581_v23 = vmov 0   ;;  %s582_s8 = smov 127  }
  0x3b   : > { %v211_v9 = vshrl.u32 %v210_v7, 7  ;;  %460 = vset.pattern.permute.xlu0 %v581_v23  ;;  %s392_s15 = sshll.u32 %s568_s12, 7  ;;  %s190_s16 = scalar_lea.vmem [#allocation5], %s383_s29 }
  0x3c   : > { %v201_v3 = vsel %vm199_vm0, %v197_v1, 0.0  ;;  %v209_v8 = vunpack.c.0.s8 %v208_v6  ;;  %s192_s21 = scalar_select %p191_p8, %s568_s12, 1 }
  0x3d   : > { %v202_v4 = vadd.f32 %v201_v3, %v200_v2  ;;  %s279_s18 = sshll.u32 %s190_s16, 4  ;;  %s735_s25 = scalar_lea.hbm %s786_s2, %s392_s15  ;;  %s737_s18 = int_to_ptr.vmem [resolvable:$true] %s279_s18 }
  0x3e   : > { %v212_v10 = vsub.s32 %v209_v8, %v211_v9  ;;  %s385_s30 = sshll.u32 %s192_s21, 2  ;;  %s263_s26 = scalar_lea.sflag [#allocation4], %s710_s28 }
  0x3f   : > { %203 = vadd.xlane.f32.xlu0 %v202_v4  ;;  %s194_s7 = scalar_lea.vmem %s785_s1, %s385_s30  ;;  %s494_s27 = scalar_lea.vmem %s737_s18, 128 }
  0x40   : > { %v226_v24 = vld [vmem:[%s194_s7] sm:$0xf]  ;;  %p495_p9 = scmp.ne.s32.totalorder %s737_s18, %s494_s27  ;;  %p795_p11 = scmp.ne.s32.totalorder %s790_s22, 0 }
  0x41   : > { %s583_s12 = smov [#allocation5]  }
  0x42   : > { %p496_p0 = pnand %p495_p9, %p795_p11  ;;  %s498_s29 = sshll.u32 %s583_s12, 4  ;;  %s499_s29 = int_to_ptr.vmem [resolvable:$false] %s498_s29 }
  0x43   : > { %s500_s3 = scalar_lea.vmem %s499_s29, 256  ;;  %p501_p13 = scmp.lt.s32.totalorder %s737_s18, %s499_s29 }
  0x44   : > { %p497_p7 = pneg %p496_p0  ;;  %p502_p3 = scmp.lt.s32.totalorder %s500_s3, %s494_s27 }
  0x46   : > { %p503_p6 = por %p502_p3, %p501_p13 }
  0x48   : > { %p504_p4 = pnand %p503_p6, %p497_p7 }
  0xcc   : > { %v204_v11 = vpop.xlane.xlu0 %203 }
  0xcd   : > { %v205_v12 = vmul.f32 0.00390625, %v204_v11 }
  0xcf   : > { %v213_v13 = vrot.slane %v205_v12, %v212_v10 }
  0xd1   : > { %v215_v14 = vsub.f32 %v195_v0, %v213_v13 }
  0xd3   : > { %v216_v15 = vmul.f32 %v215_v14, %v215_v14 }
  0xd5   : > { %v218_v16 = vcombine.high %v216_v15, %v216_v15  ;;  %v220_v17 = vsel %vm199_vm0, %v216_v15, 0.0 }
  0xd7   : > { %v221_v18 = vsel %vm199_vm0, %v218_v16, 0.0 }
  0xd8   : > { %v222_v19 = vadd.f32 %v221_v18, %v220_v17 }
  0xda   : > { %223 = vadd.xlane.f32.xlu0 %v222_v19 }
 0x167   : > { %v224_v21 = vpop.xlane.xlu0 %223 }
 0x168   : > { %v225_v22 = vmul.f32 0.00390625, %v224_v21 }
 0x16a   : > { %462 = vrsqrt.f32 %v225_v22 }
 0x174   : > { %v463_v25 = vpop.eup %462 }
 0x175   : > { %v228_v26 = vmul.f32 %v463_v25, %v226_v24 }
 0x177   : > { %v229_v27 = vmul.f32 %v228_v26, %v205_v12 }
 0x179   : > { %231 = vrot.lane.b32.xlu1 %v229_v27, %s582_s8 }
 0x17d   : > { %237 = vperm.xlu1 %459, %v228_v26  }
 0x1eb   : > { %v232_v28 = vpop.permute.xlu1 %231 }
 0x1ec   : > { %v234_v29 = vsub.f32 %v226_v24, %v232_v28 }
 0x1ee   : > { %250 = vperm.xlu0 %460, %v234_v29  }
 0x1fc   : > { %v238_v30 = vpop.permute.xlu1 %237 }
 0x1fd   : > { %v245_v31 = vrot.slane %v238_v30, %v212_v10 }
 0x1ff   : > { %v247_v33 = vmul.f32 %v245_v31, %v195_v0 }
 0x26d   : > { %v251_v32 = vpop.permute.xlu0 %250 }
 0x26e   : > { %v258_v34 = vrot.slane %v251_v32, %v212_v10 }
 0x270   : > { %v260_v35 = vadd.f32 %v258_v34, %v247_v33 }
 0x272   : > { %261 = vst [vmem:[%s190_s16] sm:$0xff] %v260_v35 }
 0x273   : > { %507 = shalt.err (!%p504_p4)
}
 0x274   : > { %s508_s28 = scalar_lea.hbm %s735_s25, 128  ;;  %s512_s30 = scalar_lea.hbm %s786_s2, 256 }
 0x275   : > { %p509_p10 = scmp.ne.s32.totalorder %s735_s25, %s508_s28  ;;  %p513_p2 = scmp.lt.u32.totalorder %s735_s25, %s786_s2 }
 0x276   : > { %p514_p5 = scmp.lt.u32.totalorder %s512_s30, %s508_s28  ;;  %p516_p9 = scmp.lt.u32.totalorder %s508_s28, %s735_s25 }
 0x277   : > { %p510_p12 = pnand %p509_p10, %p795_p11 }
 0x278   : > { %p515_p8 = por %p514_p5, %p513_p2 }
 0x279   : > { %p511_p1 = pneg %p510_p12 }
 0x27a   : > { %p517_p0 = por %p516_p9, %p515_p8 }
 0x27c   : > { %p518_p7 = pnand %p517_p0, %p511_p1 }
 0x27e   : > { %521 = shalt.err (!%p518_p7)
}
 0x27f   : > { %395 = dma.vmem_to_hbm [thread:$0]  (%p795_p11), %s737_s18, 128, %s735_s25, %s263_s26  }
 0x280 PF: > { %s291_s7 = sand.u32 1, %s556_s9   ;;  %p796_p13 = scmp.ne.s32.totalorder %s791_s24, 0 }
 0x281   : > { %p797_p3 = scmp.ge.s32.totalorder %s576_s14, 2  ;;  %s292_s8 = scalar_lea.sflag [#allocation4], %s291_s7 }
 0x283   : > { %p402_p6 = pnand %p797_p3, %p796_p13 }
 0x285   : > { %551 = dma.done.wait (!%p402_p6), %s292_s8, 128  }
 0x286   : > { %553 = vsyncadd (!%p402_p6), %s292_s8, 4294967168  ;;  %s18_s14 = sadd.s32 1, %s576_s14   ;;  %s798_s9 = smov %s560_s10 }
 0x287   : > { %p15_p4 = scmp.ge.s32.totalorder %s18_s14, 4   ;;  %s799_s10 = smov %s564_s11 }
 0x288   : > { %s800_s11 = smov %s655_s23  ;;  %s801_s12 = smov %s572_s13 }
 0x289   : > { %s802_s13 = smov %s804_s17  ;;  %17 = sbr.rel (!%p15_p4) target bundleno = 6 (0x6), region = 76 }
 0x290   :  { %297 = vsyncpa [#allocation3], 1 }
 0x291   :  { %299 = vsyncpa [#allocation3 + $0x1], 1 }
 0x292   :  { %300 = vsyncpa [#allocation4], 1 }
 0x293   :  { %302 = vsyncpa [#allocation4 + $0x1], 1 }

</bundles_post_ra>
